<compile_context>
chip_gen: v6e
topology: v6e:2x2x1
jax: 0.10.0
libtpu: 0.0.40
codegen_flags: <defaults>
</compile_context>

<pallas_src>
import math

import jax
import jax.numpy as jnp
from jax.experimental import pallas as pl
from jax.experimental.pallas import tpu as pltpu


def _linear_kernel(x_ref, w_ref, b_ref, o_ref):
    """One row tile of  y = x @ W_eff + b_eff.

    x_ref: (n_tile, width) activation tile (lane-packed when possible)
    w_ref: (width, cols)   resident effective weight (W^T or block-diag W^T)
    b_ref: (1, cols)       resident effective bias
    o_ref: (n_tile, cols)  output tile
    """
    y = jnp.dot(x_ref[...], w_ref[...], preferred_element_type=jnp.float32)
    o_ref[...] = (y + b_ref[...]).astype(o_ref.dtype)


def _round_up(x, m):
    return ((x + m - 1) // m) * m


_ROW_TILE_CAP = 4096     # packed rows/tile (~2 MiB f32 per buffered x tile)
_ROW_TILE_MIN = 1024     # packed rows/tile (>= ~512 KiB HBM DMA per step)
_TARGET_BLOCKS = 8       # aim for >= 2 grid steps per v7x TensorCore
_FAST_PATH_ROWS = 4096   # below this, plain XLA beats pallas_call overhead


def linear_multi_subset_forward(features, weight, bias, *,
                                min_pallas_rows=_FAST_PATH_ROWS):
    """preds = out_fc(features).squeeze(-1)   (pairwise_svm inference path)."""
    *lead, F = features.shape
    O, Fw = weight.shape
    assert F == Fw, "feature dim mismatch"
    N = math.prod(lead) if lead else 1

    x2d = features.reshape(N, F)
    w_t = jnp.transpose(weight)                 # (F, O): natural MXU RHS layout

    # ---- small-N fast path -------------------------------------------------
    if N < min_pallas_rows:
        y = (x2d @ w_t + bias[None, :]).astype(features.dtype)
        y = y.reshape(*lead, O)
        return y[..., 0] if O == 1 else y

    # ---- lane packing (free, contiguous reshape) ---------------------------
    pack = 128 // F if (F <= 128 and 128 % F == 0) else 1
    if pack > 1 and N % pack != 0:
        pack = 1                                 # unpacked fallback, no copies
    if pack > 1:
        width = pack * F                         # 128 lanes
        n_rows = N // pack
        x_in = x2d.reshape(n_rows, width)
        w_eff = jnp.kron(jnp.eye(pack, dtype=w_t.dtype), w_t)   # (128, pack*O)
        b_eff = jnp.tile(bias, pack).reshape(1, pack * O)
    else:
        width = F
        n_rows = N
        x_in = x2d
        w_eff = w_t                              # (F, O)
        b_eff = bias.reshape(1, O)
    cols = pack * O

    # ---- row-tile size ------------------------------------------------------
    if n_rows <= _ROW_TILE_MIN:
        n_tile = n_rows                          # single full-array block
    else:
        n_tile = _round_up(pl.cdiv(n_rows, _TARGET_BLOCKS), 8)
        n_tile = max(_ROW_TILE_MIN, min(_ROW_TILE_CAP, n_tile))

    grid = (pl.cdiv(n_rows, n_tile),)            # ragged last block is masked

    y2d = pl.pallas_call(
        _linear_kernel,
        out_shape=jax.ShapeDtypeStruct((n_rows, cols), features.dtype),
        grid_spec=pltpu.PrefetchScalarGridSpec(
            num_scalar_prefetch=0,
            grid=grid,
            in_specs=[
                pl.BlockSpec((n_tile, width), lambda i: (i, 0)),  # x row tile
                pl.BlockSpec((width, cols), lambda i: (0, 0)),    # weight, resident
                pl.BlockSpec((1, cols), lambda i: (0, 0)),        # bias, resident
            ],
            out_specs=pl.BlockSpec((n_tile, cols), lambda i: (i, 0)),
        ),
        compiler_params=pltpu.CompilerParams(
            dimension_semantics=("parallel",),
            vmem_limit_bytes=32 * 1024 * 1024,
        ),
    )(x_in, w_eff, b_eff)

    # Layout plumbing back to the module's output shape.
    y = y2d.reshape(N, O).reshape(*lead, O)
    return y[..., 0] if O == 1 else y


def _reference(features, weight, bias):
    # f32-accurate VPU reference (avoids MXU precision ambiguity).
    y = jnp.sum(features[..., None, :] * weight, axis=-1) + bias
    return y[..., 0] if weight.shape[0] == 1 else y


if __name__ == "__main__":
    key = jax.random.PRNGKey(0)

    def make_case(k, lead, num_agent_features, out_features=1):
        F = 8 * num_agent_features               # in_features = 8 * sum(nlf)
        kx, kw, kb = jax.random.split(k, 3)
        limit = 1.0 / math.sqrt(F)                # nn.Linear default init range
        feats = jax.random.normal(kx, (*lead, F), jnp.float32)
        w = jax.random.uniform(kw, (out_features, F), jnp.float32, -limit, limit)
        b = jax.random.uniform(kb, (out_features,), jnp.float32, -limit, limit)
        return feats, w, b

    keys = jax.random.split(key, 3)

    # 1) Module default shape (batch=2, subsets=8, F=8*4=32): small-N fast path.
    f, w, b = make_case(keys[0], (2, 8), 4)
    out = jax.block_until_ready(linear_multi_subset_forward(f, w, b))
    assert out.shape == (2, 8)
    assert jnp.allclose(out, _reference(f, w, b), atol=1e-4, rtol=1e-4)

    # 2) Same tiny shape forced through the Pallas kernel (packed path).
    out = jax.block_until_ready(
        linear_multi_subset_forward(f, w, b, min_pallas_rows=0))
    assert out.shape == (2, 8)
    assert jnp.allclose(out, _reference(f, w, b), atol=1e-4, rtol=1e-4)

    # 3) Larger batch: packed path, multi-step grid with a ragged last block.
    f, w, b = make_case(keys[1], (4, 2500), 4)
    out = jax.block_until_ready(
        linear_multi_subset_forward(f, w, b, min_pallas_rows=0))
    assert out.shape == (4, 2500)
    assert jnp.allclose(out, _reference(f, w, b), atol=1e-4, rtol=1e-4)

    # 4) F=24 (num_agent_features=3) does not divide 128 and N is not a
    #    multiple of 8: unpacked fallback path, full-array block.
    f, w, b = make_case(keys[2], (3, 70), 3)
    out = jax.block_until_ready(
        linear_multi_subset_forward(f, w, b, min_pallas_rows=0))
    assert out.shape == (3, 70)
    assert jnp.allclose(out, _reference(f, w, b), atol=1e-4, rtol=1e-4)

    print("KERNEL_OK")
</pallas_src>

<mosaic_0001>
module attributes {stable_mosaic.version = 11 : i64} {
  func.func @_linear_kernel(%arg0: i32, %arg1: memref<4x128xf32, #tpu.memory_space<vmem>>, %arg2: memref<128x4xf32, #tpu.memory_space<vmem>>, %arg3: memref<1x4xf32, #tpu.memory_space<vmem>>, %arg4: memref<4x4xf32, #tpu.memory_space<vmem>>) attributes {dimension_semantics = [#tpu.dimension_semantics<parallel>], iteration_bounds = array<i64: 1>, scalar_prefetch = 0 : i64, scratch_operands = 0 : i64, tpu.core_type = #tpu.core_type<tc>, window_params = [{transform_indices = @transform_0, window_bounds = array<i64: 4, 128>}, {pipeline_mode = #tpu.pipeline_mode<synchronous>, transform_indices = @transform_1, window_bounds = array<i64: 128, 4>}, {pipeline_mode = #tpu.pipeline_mode<synchronous>, transform_indices = @transform_2, window_bounds = array<i64: 1, 4>}, {transform_indices = @transform_3, window_bounds = array<i64: 4, 4>}]} {
    %c0 = arith.constant 0 : index
    %c0_0 = arith.constant 0 : index
    %0 = vector.load %arg1[%c0, %c0_0] : memref<4x128xf32, #tpu.memory_space<vmem>>, vector<4x128xf32>
    %c0_1 = arith.constant 0 : index
    %c0_2 = arith.constant 0 : index
    %1 = vector.load %arg2[%c0_1, %c0_2] : memref<128x4xf32, #tpu.memory_space<vmem>>, vector<128x4xf32>
    %cst = arith.constant dense<0.000000e+00> : vector<4x4xf32>
    %2 = tpu.matmul %0, %1, %cst {dimension_numbers = #tpu.dot_dimension_numbers<[1], [0], [0], [1], [0, 0, 1, 1], [], []>} : vector<4x128xf32>, vector<128x4xf32>, vector<4x4xf32> -> vector<4x4xf32>
    %c0_3 = arith.constant 0 : index
    %c0_4 = arith.constant 0 : index
    %3 = vector.load %arg3[%c0_3, %c0_4] : memref<1x4xf32, #tpu.memory_space<vmem>>, vector<1x4xf32>
    %4 = vector.broadcast %3 : vector<1x4xf32> to vector<4x4xf32>
    %5 = arith.addf %2, %4 : vector<4x4xf32>
    %c0_5 = arith.constant 0 : index
    %c0_6 = arith.constant 0 : index
    %6 = vector.load %arg4[%c0_5, %c0_6] : memref<4x4xf32, #tpu.memory_space<vmem>>, vector<4x4xf32>
    tpu.vector_store %arg4[%c0_5, %c0_6], %5 {strides = array<i32>} : memref<4x4xf32, #tpu.memory_space<vmem>>, vector<4x4xf32>,
    return
  }
  func.func @transform_0(%arg0: i32) -> (i32, i32) {
    %c0_i32 = arith.constant 0 : i32
    %c0_i32_0 = arith.constant 0 : i32
    return %arg0, %c0_i32 : i32, i32
  }
  func.func @transform_1(%arg0: i32) -> (i32, i32) {
    %c0_i32 = arith.constant 0 : i32
    %c0_i32_0 = arith.constant 0 : i32
    %c0_i32_1 = arith.constant 0 : i32
    return %c0_i32, %c0_i32_0 : i32, i32
  }
  func.func @transform_2(%arg0: i32) -> (i32, i32) {
    %c0_i32 = arith.constant 0 : i32
    %c0_i32_0 = arith.constant 0 : i32
    %c0_i32_1 = arith.constant 0 : i32
    return %c0_i32, %c0_i32_0 : i32, i32
  }
  func.func @transform_3(%arg0: i32) -> (i32, i32) {
    %c0_i32 = arith.constant 0 : i32
    %c0_i32_0 = arith.constant 0 : i32
    return %arg0, %c0_i32 : i32, i32
  }
}

</mosaic_0001>

<bundles_post_ra>
// kernel: tpu_custom_call.1
= control target key start
LH: loop header
LB: loop body
LE: loop exit
PB: predicated region body
PF: predicated region fallthrough
CT: control target
= control target key end

     0   :  { %v203_v1 = vmov 0.0   ;;  %vm204_vm0 = vmmov 0   ;;  %s283_s0 = inlined_call_operand.vmem [shape: f32[4,128], index: 0, kind: input, shape index: {}]   ;;  %s284_s1 = inlined_call_operand.vmem [shape: f32[128,4], index: 1, kind: input, shape index: {}]   ;;  %s285_s2 = inlined_call_operand.vmem [shape: f32[1,4], index: 2, kind: input, shape index: {}]   ;;  %s286_s3 = inlined_call_operand.hbm [shape: f32[4,4], index: 3, kind: output, shape index: {}]  }
   0x1   :  { %v31_v0 = vld [vmem:[%s284_s1 + $0x78] sm:$0xff]  ;;  %143 = vmatprep.subr.mxu0 %v203_v1  ;;  %v30_v2 = vld [vmem:[%s284_s1 + $0x70] sm:$0xff]  ;;  %175 = vmatprep.mubr.msk.f32.mxu0 %vm204_vm0, %v203_v1  ;;  %v29_v3 = vld [vmem:[%s284_s1 + $0x68] sm:$0xff] }
   0x2   :  { %144 = vmatpush3.msra.mxu0 %v31_v0  ;;  %v28_v4 = vld [vmem:[%s284_s1 + $0x60] sm:$0xff] }
   0x3   :  { %145 = vmatprep.subr.mxu0 %v203_v1 }
   0x4   :  { %146 = vmatpush3.msra.mxu0 %v30_v2 }
   0x5   :  { %147 = vmatprep.subr.mxu0 %v203_v1 }
   0x6   :  { %148 = vmatpush3.msra.mxu0 %v29_v3 }
   0x7   :  { %8 = vsyncpa [#allocation3], 0  ;;  %149 = vmatprep.subr.mxu0 %v203_v1  ;;  %v27_v5 = vld [vmem:[%s284_s1 + $0x58] sm:$0xff]  ;;  %v26_v6 = vld [vmem:[%s284_s1 + $0x50] sm:$0xff]  ;;  %s205_s21 = smov [#allocation2]   ;;  %vm109_vm1 = vcmask 27648  }
   0x8   :  { %150 = vmatpush3.msra.mxu0 %v28_v4  ;;  %v25_v7 = vld [vmem:[%s284_s1 + $0x48] sm:$0xff]  ;;  %v24_v8 = vld [vmem:[%s284_s1 + $0x40] sm:$0xff]  ;;  %v23_v9 = vld [vmem:[%s284_s1 + $0x38] sm:$0xff]  ;;  %s117_s22 = sshll.u32 %s205_s21, 4  ;;  %s118_s22 = int_to_ptr.vmem [resolvable:$true] %s117_s22 }
   0x9   :  { %151 = vmatprep.subr.mxu0 %v203_v1  ;;  %v22_v10 = vld [vmem:[%s284_s1 + $0x30] sm:$0xff]  ;;  %v21_v11 = vld [vmem:[%s284_s1 + $0x28] sm:$0xff]  ;;  %v20_v12 = vld [vmem:[%s284_s1 + $0x20] sm:$0xff]  ;;  %p186_p1 = scmp.lt.s32.totalorder %s118_s22, %s118_s22 }
   0xa   :  { %152 = vmatpush3.msra.mxu0 %v27_v5  ;;  %v19_v13 = vld [vmem:[%s284_s1 + $0x18] sm:$0xff]  ;;  %v18_v14 = vld [vmem:[%s284_s1 + $0x10] sm:$0xff]  ;;  %v17_v15 = vld [vmem:[%s284_s1 + $0x8] sm:$0xff] }
   0xb   :  { %153 = vmatprep.subr.mxu0 %v203_v1  ;;  %v16_v16 = vld [vmem:[%s284_s1] sm:$0xff]  ;;  %s181_s1 = scalar_lea.vmem %s118_s22, 64 }
   0xc   :  { %154 = vmatpush3.msra.mxu0 %v26_v6  ;;  %v15_v17 = vld [vmem:[%s283_s0] sm:$0xf]  ;;  %p182_p0 = scmp.ne.s32.totalorder %s118_s22, %s181_s1  ;;  %p187_p2 = scmp.lt.s32.totalorder %s181_s1, %s181_s1 }
   0xd   :  { %155 = vmatprep.subr.mxu0 %v203_v1  ;;  %v125_v18 = vld [vmem:[%s285_s2] ss:$0 sm:$0xff] }
   0xe   :  { %156 = vmatpush3.msra.mxu0 %v25_v7  ;;  %p188_p3 = por %p187_p2, %p186_p1 }
   0xf   :  { %157 = vmatprep.subr.mxu0 %v203_v1 }
  0x10   :  { %158 = vmatpush3.msra.mxu0 %v24_v8  ;;  %p189_p4 = pnand %p188_p3, %p182_p0 }
  0x11   :  { %159 = vmatprep.subr.mxu0 %v203_v1 }
  0x12   :  { %160 = vmatpush3.msra.mxu0 %v23_v9 }
  0x13   :  { %161 = vmatprep.subr.mxu0 %v203_v1 }
  0x14   :  { %162 = vmatpush3.msra.mxu0 %v22_v10 }
  0x15   :  { %163 = vmatprep.subr.mxu0 %v203_v1 }
  0x16   :  { %164 = vmatpush3.msra.mxu0 %v21_v11 }
  0x17   :  { %165 = vmatprep.subr.mxu0 %v203_v1 }
  0x18   :  { %166 = vmatpush3.msra.mxu0 %v20_v12 }
  0x19   :  { %167 = vmatprep.subr.mxu0 %v203_v1 }
  0x1a   :  { %168 = vmatpush3.msra.mxu0 %v19_v13 }
  0x1b   :  { %169 = vmatprep.subr.mxu0 %v203_v1 }
  0x1c   :  { %170 = vmatpush3.msra.mxu0 %v18_v14 }
  0x1d   :  { %171 = vmatprep.subr.mxu0 %v203_v1 }
  0x1e   :  { %172 = vmatpush3.msra.mxu0 %v17_v15 }
  0x1f   :  { %173 = vmatprep.subr.mxu0 %v203_v1 }
  0x20   :  { %174 = vmatpush3.msra.mxu0 %v16_v16 }
  0x21   :  { %176 = vmatmul.mubr.f32.vlgmr.msra.gmra.mxu0 %v15_v17 }
  0xe1   :  { %v105_v19 = vpop.f32.mrf.mxu0 }
  0xe2   :  { %v106_v20 = vadd.f32 %v125_v18, %v105_v19 }
  0xe3   :  { %v177_v21 = vpop.f32.mrf.mxu0 }
  0xe4   :  { %110 = vst.msk [vmem:[#allocation2] sm:$0xf] %vm109_vm1, %v106_v20 }
  0xe5   :  { %192 = shalt.err (!%p189_p4)
}
  0xe6   :  { %120 = dma.vmem_to_hbm [thread:$0]  %s118_s22, 64, %s286_s3, [#allocation3]  }
  0xe7   :  { %201 = dma.done.wait [#allocation3], 64  }
  0xe8   :  { %202 = vsyncadd [#allocation3], 4294967232 }
  0xe9   :  { %124 = vsyncpa [#allocation3], 1 }

</bundles_post_ra>
